<compile_context>
chip_gen: v7x
topology: tpu7x:2x2x1
jax: 0.10.0
libtpu: 0.0.40
codegen_flags: <defaults>
</compile_context>

<pallas_src>
import functools

import numpy as np
import jax
import jax.numpy as jnp
from jax.experimental import pallas as pl
from jax.experimental.pallas import tpu as pltpu


_VMEM_OUT_BUDGET_BYTES = 8 * 1024 * 1024   # per output buffer (Pallas double-buffers it)
_VMEM_LIMIT_BYTES = 32 * 1024 * 1024       # safe on v5e/v6e (128 MiB phys) and v7x (64 MiB)


# ------------------------------ Pallas kernel ------------------------------ #
def _anchor_kernel(params_ref, out_ref, *, stride, rows_per_block):
    # params_ref: (4, WA_pad)  row-invariant planes: [x, w, h_fixed, angle_wrapped]
    # out_ref:    (5, rows_per_block, WA_pad) planes: [x, y, w, h, angle]
    i = pl.program_id(0)
    wa = out_ref.shape[-1]
    shape = (rows_per_block, wa)
    half = float(stride // 2)

    row = (jax.lax.broadcasted_iota(jnp.int32, shape, 0)
           + i * rows_per_block).astype(jnp.float32)

    out_ref[0] = jnp.broadcast_to(params_ref[0, :], shape)   # x (column-dependent only)
    out_ref[1] = row * float(stride) + half                  # y (the only row-dependent plane)
    out_ref[2] = jnp.broadcast_to(params_ref[1, :], shape)   # w
    out_ref[3] = jnp.broadcast_to(params_ref[2, :], shape)   # h (post h>=w fix-up)
    out_ref[4] = jnp.broadcast_to(params_ref[3, :], shape)   # angle (post -90 shift + wrap)


def _pick_rows_per_block(h_pad, wa_pad):
    """Largest divisor of h_pad (multiple of 8) under the VMEM budget, keeping >=2 grid
    steps when possible (v7x dual-TensorCore sharding via "parallel" semantics)."""
    bytes_per_row = 5 * wa_pad * 4
    max_rows = max(8, ((_VMEM_OUT_BUDGET_BYTES // bytes_per_row) // 8) * 8)
    min_blocks = 2 if h_pad >= 16 else 1
    best = 8
    for d in range(8, h_pad + 1, 8):
        if h_pad % d == 0 and d <= max_rows and (h_pad // d) >= min_blocks:
            best = d
    return best


def _host_anchor_planes(anchor_sizes, aspect_ratios, anchor_angles, W, stride):
    """Host-side (numpy) precompute of the row-invariant planes, fix-ups included.

    Reproduces the reference post-processing exactly, including the numpy broadcast of
    column `w` into h wherever h >= w (anchors[h_gt_w, 2:4] = anchors[h_gt_w, 2:4][:, :-1])
    and the single-pass angle wrap. Returns (planes[4, W*A], A).
    """
    sizes = np.asarray(anchor_sizes, np.float64)
    sqrt_r = np.sqrt(np.asarray(aspect_ratios, np.float64))
    angles = np.asarray(anchor_angles, np.float64).reshape(-1)

    # Note the (hs, ws) swap performed by the reference generate_anchors():
    #   "w" column = size * sqrt(ratio), "h" column = size / sqrt(ratio)
    w_rs = (sqrt_r[:, None] * sizes[None, :]).reshape(-1)
    h_rs = (sizes[None, :] / sqrt_r[:, None]).reshape(-1)
    na = int(angles.shape[0])
    w_per = np.tile(w_rs, na)
    h_per = np.tile(h_rs, na)
    a_per = np.repeat(angles, w_rs.shape[0])
    A = int(w_per.shape[0])

    h_ge_w = h_per >= w_per
    h_fixed = np.where(h_ge_w, w_per, h_per)         # h <- w where h >= w
    ang = np.where(h_ge_w, a_per - 90.0, a_per)      # angle -= 90 where h >= w
    ang = np.where(ang < -90.0, ang + 180.0, ang)
    ang = np.where(ang > 90.0, ang - 180.0, ang)

    x_cols = np.arange(W, dtype=np.float64) * stride + (stride // 2)
    x_plane = np.repeat(x_cols, A)                   # x per (col, anchor)

    planes = np.stack([x_plane,
                       np.tile(w_per, W),
                       np.tile(h_fixed, W),
                       np.tile(ang, W)], axis=0).astype(np.float32)   # (4, W*A)
    return planes, A


def generate_anchors_pallas(anchor_sizes, aspect_ratios, anchor_angles, H, W, stride):
    """Returns anchors of shape (H*W*A, 5): [x_center, y_center, w, h, angle]."""
    stride = int(stride)
    planes, A = _host_anchor_planes(anchor_sizes, aspect_ratios, anchor_angles, W, stride)

    WA = W * A
    WA_pad = ((WA + 127) // 128) * 128     # lane-dense output (unmasked vst)
    H_pad = ((H + 7) // 8) * 8             # sublane-aligned row tiles

    params = np.zeros((4, WA_pad), np.float32)
    params[:, :WA] = planes
    params = jnp.asarray(params)

    rows_per_block = _pick_rows_per_block(H_pad, WA_pad)
    kernel = functools.partial(_anchor_kernel, stride=stride, rows_per_block=rows_per_block)

    out = pl.pallas_call(
        kernel,
        out_shape=jax.ShapeDtypeStruct((5, H_pad, WA_pad), jnp.float32),
        grid=(H_pad // rows_per_block,),
        in_specs=[pl.BlockSpec((4, WA_pad), lambda i: (0, 0))],
        out_specs=pl.BlockSpec((5, rows_per_block, WA_pad), lambda i: (0, i, 0)),
        compiler_params=pltpu.CompilerParams(
            dimension_semantics=("parallel",),
            vmem_limit_bytes=_VMEM_LIMIT_BYTES,
        ),
    )(params)

    # Strip padding, then (5, H, W*A) -> (H*W*A, 5); flat index = (row*W + col)*A + anchor.
    # This layout change runs once per feature-map shape (result is cached by the module).
    out = out[:, :H, :WA]
    return jnp.transpose(out, (1, 2, 0)).reshape(H * W * A, 5)


# ------------------------------ Module wrapper ------------------------------ #
class AnchorGenerator:
    """JAX/Pallas equivalent of the PyTorch AnchorGenerator (no learned parameters)."""

    def __init__(self, anchor_sizes=(128, 256, 512), aspect_ratios=(0.5, 1.0, 2.0),
                 anchor_strides=(16,), anchor_angles=(-90.0,), straddle_thresh=0):
        if len(anchor_strides) == 1:
            self.anchor_sizes = [anchor_sizes]
        else:
            raise NotImplementedError("Multiple anchor strides not implemented")
        self.anchor_angles = anchor_angles
        self.aspect_ratios = aspect_ratios
        self.strides = anchor_strides
        self.straddle_thresh = straddle_thresh
        self._cache = {}   # (H, W) -> anchors; fully static given the feature-map shape

    def num_anchors_per_location(self):
        return [len(sizes) * len(self.aspect_ratios) * len(self.anchor_angles)
                for sizes in self.anchor_sizes]

    def __call__(self, image_tensor, feature_map):
        h, w = int(feature_map.shape[-2]), int(feature_map.shape[-1])
        key = (h, w)
        if key not in self._cache:
            self._cache[key] = generate_anchors_pallas(
                self.anchor_sizes[0], self.aspect_ratios, self.anchor_angles,
                h, w, self.strides[0])
        anchors = self._cache[key]
        # one (identical) anchor tensor per image in the batch, as in the reference
        return [anchors for _ in range(image_tensor.shape[0])]


# ------------------------- NumPy reference (validation) ------------------------- #
def _np_enum_ratios_and_thetas2(anchors, anchor_ratios, anchor_angles):
    a_ws = anchors[:, 2]
    a_hs = anchors[:, 3]
    sqrt_ratios = np.sqrt(anchor_ratios)
    ws = np.reshape(a_ws / sqrt_ratios[:, None], -1)
    hs = np.reshape(a_hs * sqrt_ratios[:, None], -1)
    ws, _ = np.meshgrid(ws, anchor_angles)
    hs, anchor_angles = np.meshgrid(hs, anchor_angles)
    anchor_angles = np.reshape(anchor_angles, [-1, 1])
    ws = np.reshape(ws, [-1, 1])
    hs = np.reshape(hs, [-1, 1])
    return (hs, ws, anchor_angles)


def _np_generate_anchors(anchor_sizes, anchor_ratios, anchor_angles, height, width, stride):
    N_sizes = len(anchor_sizes)
    base_anchors = np.zeros((N_sizes, 4), np.float32)
    base_anchors[:, 2] = anchor_sizes
    base_anchors[:, 3] = anchor_sizes
    ws, hs, angles = _np_enum_ratios_and_thetas2(base_anchors, anchor_ratios, anchor_angles)
    x_centers = np.arange(width, dtype=np.float32) * stride + stride // 2
    y_centers = np.arange(height, dtype=np.float32) * stride + stride // 2
    x_centers, y_centers = np.meshgrid(x_centers, y_centers)
    angles, _ = np.meshgrid(angles, x_centers)
    ws, x_centers = np.meshgrid(ws, x_centers)
    hs, y_centers = np.meshgrid(hs, y_centers)
    anchor_centers = np.stack([x_centers, y_centers], 2)
    anchor_centers = np.reshape(anchor_centers, [-1, 2])
    box_parameters = np.stack([ws, hs, angles], axis=2)
    box_parameters = np.reshape(box_parameters, [-1, 3])
    anchors = np.concatenate([anchor_centers, box_parameters], axis=1)
    h_gt_w = anchors[:, 3] >= anchors[:, 2]
    anchors[h_gt_w, 2:4] = anchors[h_gt_w, 2:4][:, :-1]
    anchors[h_gt_w, -1] -= 90
    anchors[anchors[:, -1] < -90, -1] += 180
    anchors[anchors[:, -1] > 90, -1] -= 180
    return anchors


if __name__ == "__main__":
    key = jax.random.PRNGKey(0)
    k1, k2, k3 = jax.random.split(key, 3)
    # image_tensor only contributes its batch size; feature_map only its (H, W).
    image_tensor = jax.random.normal(k1, (2, 3, 64, 64), dtype=jnp.float32)
    feature_map = jax.random.normal(k2, (2, 4, 16, 16), dtype=jnp.float32)

    anchor_sizes = (32.0, 64.0)
    aspect_ratios = (0.5, 1.0, 2.0)
    anchor_angles = (-90.0, -45.0, 0.0, 45.0)
    stride = 16
    A = len(anchor_sizes) * len(aspect_ratios) * len(anchor_angles)

    gen = AnchorGenerator(anchor_sizes=anchor_sizes, aspect_ratios=aspect_ratios,
                          anchor_strides=(stride,), anchor_angles=anchor_angles)

    # --- aligned case: H=W=16, W*A = 384 (multiple of 128) ---
    anchors_list = gen(image_tensor, feature_map)
    anchors = jax.block_until_ready(anchors_list[0])
    ref = _np_generate_anchors(anchor_sizes, aspect_ratios, anchor_angles, 16, 16, stride)
    assert len(anchors_list) == image_tensor.shape[0]
    assert anchors.shape == ref.shape == (16 * 16 * A, 5)
    np.testing.assert_allclose(np.asarray(anchors), ref.astype(np.float32),
                               rtol=1e-5, atol=1e-3)

    # repeated call hits the per-shape cache (no recompute / recompile)
    anchors_list_again = gen(image_tensor, feature_map)
    assert anchors_list_again[0] is anchors_list[0]

    # --- padded case: H=W=10 (H not multiple of 8, W*A = 240 not multiple of 128) ---
    feature_map2 = jax.random.normal(k3, (2, 4, 10, 10), dtype=jnp.float32)
    anchors2 = jax.block_until_ready(gen(image_tensor, feature_map2)[0])
    ref2 = _np_generate_anchors(anchor_sizes, aspect_ratios, anchor_angles, 10, 10, stride)
    assert anchors2.shape == ref2.shape == (10 * 10 * A, 5)
    np.testing.assert_allclose(np.asarray(anchors2), ref2.astype(np.float32),
                               rtol=1e-5, atol=1e-3)

    print("KERNEL_OK")
</pallas_src>

<mosaic_0001>
module attributes {stable_mosaic.version = 11 : i64} {
  func.func @_anchor_kernel(%arg0: i32, %arg1: memref<4x384xf32, #tpu.memory_space<vmem>>, %arg2: memref<5x8x384xf32, #tpu.memory_space<vmem>>) attributes {dimension_semantics = [#tpu.dimension_semantics<parallel>], iteration_bounds = array<i64: 2>, scalar_prefetch = 0 : i64, scratch_operands = 0 : i64, tpu.core_type = #tpu.core_type<tc>, window_params = [{pipeline_mode = #tpu.pipeline_mode<synchronous>, transform_indices = @transform_0, window_bounds = array<i64: 4, 384>}, {transform_indices = @transform_1, window_bounds = array<i64: 5, 8, 384>}]} {
    %0 = tpu.iota {dimensions = array<i32: 0>} : vector<8x384xi32>
    %c8_i32 = arith.constant 8 : i32
    %1 = arith.muli %arg0, %c8_i32 : i32
    %2 = vector.broadcast %1 : i32 to vector<8x384xi32>
    %3 = arith.addi %0, %2 : vector<8x384xi32>
    %4 = arith.sitofp %3 : vector<8x384xi32> to vector<8x384xf32>
    %c0 = arith.constant 0 : index
    %c0_0 = arith.constant 0 : index
    %5 = vector.load %arg1[%c0, %c0_0] : memref<4x384xf32, #tpu.memory_space<vmem>>, vector<1x384xf32>
    %6 = vector.shape_cast %5 : vector<1x384xf32> to vector<384xf32>
    %7 = vector.shape_cast %6 : vector<384xf32> to vector<1x384xf32>
    %8 = vector.broadcast %7 : vector<1x384xf32> to vector<8x384xf32>
    %c0_1 = arith.constant 0 : index
    %c0_2 = arith.constant 0 : index
    %c0_3 = arith.constant 0 : index
    %9 = vector.load %arg2[%c0_1, %c0_2, %c0_3] : memref<5x8x384xf32, #tpu.memory_space<vmem>>, vector<1x8x384xf32>
    %10 = vector.shape_cast %9 : vector<1x8x384xf32> to vector<8x384xf32>
    %11 = vector.shape_cast %8 : vector<8x384xf32> to vector<1x8x384xf32>
    tpu.vector_store %arg2[%c0_1, %c0_2, %c0_3], %11 {strides = array<i32>} : memref<5x8x384xf32, #tpu.memory_space<vmem>>, vector<1x8x384xf32>,
    %cst = arith.constant 1.600000e+01 : f32
    %12 = vector.broadcast %cst : f32 to vector<8x384xf32>
    %13 = arith.mulf %4, %12 : vector<8x384xf32>
    %cst_4 = arith.constant 8.000000e+00 : f32
    %14 = vector.broadcast %cst_4 : f32 to vector<8x384xf32>
    %15 = arith.addf %13, %14 : vector<8x384xf32>
    %c1 = arith.constant 1 : index
    %c0_5 = arith.constant 0 : index
    %c0_6 = arith.constant 0 : index
    %16 = vector.load %arg2[%c1, %c0_5, %c0_6] : memref<5x8x384xf32, #tpu.memory_space<vmem>>, vector<1x8x384xf32>
    %17 = vector.shape_cast %16 : vector<1x8x384xf32> to vector<8x384xf32>
    %18 = vector.shape_cast %15 : vector<8x384xf32> to vector<1x8x384xf32>
    tpu.vector_store %arg2[%c1, %c0_5, %c0_6], %18 {strides = array<i32>} : memref<5x8x384xf32, #tpu.memory_space<vmem>>, vector<1x8x384xf32>,
    %c1_7 = arith.constant 1 : index
    %c0_8 = arith.constant 0 : index
    %19 = vector.load %arg1[%c1_7, %c0_8] : memref<4x384xf32, #tpu.memory_space<vmem>>, vector<1x384xf32>
    %20 = vector.shape_cast %19 : vector<1x384xf32> to vector<384xf32>
    %21 = vector.shape_cast %20 : vector<384xf32> to vector<1x384xf32>
    %22 = vector.broadcast %21 : vector<1x384xf32> to vector<8x384xf32>
    %c2 = arith.constant 2 : index
    %c0_9 = arith.constant 0 : index
    %c0_10 = arith.constant 0 : index
    %23 = vector.load %arg2[%c2, %c0_9, %c0_10] : memref<5x8x384xf32, #tpu.memory_space<vmem>>, vector<1x8x384xf32>
    %24 = vector.shape_cast %23 : vector<1x8x384xf32> to vector<8x384xf32>
    %25 = vector.shape_cast %22 : vector<8x384xf32> to vector<1x8x384xf32>
    tpu.vector_store %arg2[%c2, %c0_9, %c0_10], %25 {strides = array<i32>} : memref<5x8x384xf32, #tpu.memory_space<vmem>>, vector<1x8x384xf32>,
    %c2_11 = arith.constant 2 : index
    %c0_12 = arith.constant 0 : index
    %26 = vector.load %arg1[%c2_11, %c0_12] : memref<4x384xf32, #tpu.memory_space<vmem>>, vector<1x384xf32>
    %27 = vector.shape_cast %26 : vector<1x384xf32> to vector<384xf32>
    %28 = vector.shape_cast %27 : vector<384xf32> to vector<1x384xf32>
    %29 = vector.broadcast %28 : vector<1x384xf32> to vector<8x384xf32>
    %c3 = arith.constant 3 : index
    %c0_13 = arith.constant 0 : index
    %c0_14 = arith.constant 0 : index
    %30 = vector.load %arg2[%c3, %c0_13, %c0_14] : memref<5x8x384xf32, #tpu.memory_space<vmem>>, vector<1x8x384xf32>
    %31 = vector.shape_cast %30 : vector<1x8x384xf32> to vector<8x384xf32>
    %32 = vector.shape_cast %29 : vector<8x384xf32> to vector<1x8x384xf32>
    tpu.vector_store %arg2[%c3, %c0_13, %c0_14], %32 {strides = array<i32>} : memref<5x8x384xf32, #tpu.memory_space<vmem>>, vector<1x8x384xf32>,
    %c3_15 = arith.constant 3 : index
    %c0_16 = arith.constant 0 : index
    %33 = vector.load %arg1[%c3_15, %c0_16] : memref<4x384xf32, #tpu.memory_space<vmem>>, vector<1x384xf32>
    %34 = vector.shape_cast %33 : vector<1x384xf32> to vector<384xf32>
    %35 = vector.shape_cast %34 : vector<384xf32> to vector<1x384xf32>
    %36 = vector.broadcast %35 : vector<1x384xf32> to vector<8x384xf32>
    %c4 = arith.constant 4 : index
    %c0_17 = arith.constant 0 : index
    %c0_18 = arith.constant 0 : index
    %37 = vector.load %arg2[%c4, %c0_17, %c0_18] : memref<5x8x384xf32, #tpu.memory_space<vmem>>, vector<1x8x384xf32>
    %38 = vector.shape_cast %37 : vector<1x8x384xf32> to vector<8x384xf32>
    %39 = vector.shape_cast %36 : vector<8x384xf32> to vector<1x8x384xf32>
    tpu.vector_store %arg2[%c4, %c0_17, %c0_18], %39 {strides = array<i32>} : memref<5x8x384xf32, #tpu.memory_space<vmem>>, vector<1x8x384xf32>,
    return
  }
  func.func @transform_0(%arg0: i32) -> (i32, i32) {
    %c0_i32 = arith.constant 0 : i32
    %c0_i32_0 = arith.constant 0 : i32
    %c0_i32_1 = arith.constant 0 : i32
    return %c0_i32, %c0_i32_0 : i32, i32
  }
  func.func @transform_1(%arg0: i32) -> (i32, i32, i32) {
    %c0_i32 = arith.constant 0 : i32
    %c0_i32_0 = arith.constant 0 : i32
    %c0_i32_1 = arith.constant 0 : i32
    return %c0_i32, %arg0, %c0_i32_0 : i32, i32, i32
  }
}

</mosaic_0001>

<bundles_post_ra>
// kernel: tpu_custom_call.1
= control target key start
LH: loop header
LB: loop body
LE: loop exit
PB: predicated region body
PF: predicated region fallthrough
CT: control target
= control target key end

     0   :  { %6 = vsyncpa [#allocation3], 0  ;;  %s607_s0 = inlined_call_operand.hbm [shape: f32[4,384], index: 0, kind: input, shape index: {}]   ;;  %s608_s1 = inlined_call_operand.hbm [shape: f32[5,16,384], index: 1, kind: output, shape index: {}]  }
   0x1   :  { %7 = vsyncpa [#allocation4], 0 }
   0x2   :  { %9 = vsyncpa [#allocation4 + $0x1], 0  ;;  %s469_s6 = smov 0   ;;  %s471_s7 = smov 0  }
   0x3   :  { %s473_s8 = smov 0   ;;  %s475_s9 = smov 0  }
   0x4 LB: > { %s490_s10 = sadd.s32 4294967295, %s452_s9   ;;  %s282_s11 = sadd.s32 4294967294, %s452_s9   ;;  %s452_s9 = sphi %s475_s9, %s624_s9   ;;  %s448_s8 = sphi %s473_s8, %s623_s8   ;;  %s444_s7 = sphi %s471_s7, %s622_s7   ;;  %s440_s6 = sphi %s469_s6, %s621_s6  }
   0x5   : > { %s494_s12 = sadd.s32 1, %s452_s9   ;;  %s43_s13 = sadd.s32 1, %s448_s8 }
   0x6   : > { %s40_s14 = ssub.s32 %s452_s9, %s494_s12  ;;  %p53_p0 = scmp.ne.s32.totalorder %s448_s8, %s444_s7 }
   0x7   : > { %p41_p1 = scmp.eq.s32.totalorder %s40_s14, 0  ;;  %p54_p2 = scmp.eq.s32.totalorder %s490_s10, 1 }
   0x8   : > { %p59_p3 = scmp.ne.s32.totalorder %s444_s7, %s440_s6  ;;  %p60_p4 = scmp.eq.s32.totalorder %s282_s11, 1 }
   0x9   : > { %s505_s15 = scalar_select %p41_p1, %s448_s8, %s43_s13  }
   0xa   : > { %p507_p5 = por %p54_p2, %p53_p0  ;;  %p511_p6 = por %p60_p4, %p59_p3 }
   0xb   : > { %p283_p7 = scmp.ge.s32.totalorder %s452_s9, 1  ;;  %p67_p8 = scmp.lt.s32.totalorder %s452_s9, 3 }
   0xc   : > { %s612_s16 = scalar_select %p507_p5, 1, 0 }
   0xd   : > { %s613_s17 = scalar_select %p511_p6, 1, 0 }
   0xe   : > { %p609_p9 = scmp.eq.s32.totalorder %s490_s10, 0  ;;  %p518_p10 = pnand %p283_p7, %p67_p8 }
   0xf   : > { %s454_s19 = smov [#allocation2]   ;;  %s358_s24 = scalar_lea.hbm %s607_s0, 192 }
  0x10   : > { %s614_s18 = scalar_select %p518_p10, 1, 0 }
  0x11   : > { %s80_s20 = sshll.u32 %s454_s19, 4  ;;  %p311_p11 = pneg %p518_p10  ;;  %s81_s20 = int_to_ptr.vmem [resolvable:$true] %s80_s20 }
  0x12   : > { %p359_p13 = scmp.ne.s32.totalorder %s607_s0, %s358_s24  ;;  %p365_p3 = scmp.lt.u32.totalorder %s358_s24, %s607_s0 }
  0x13   : > { %p526_p12 = pnand %p609_p9, %p311_p11 }
  0x15   : > { %p360_p0 = pneg %p526_p12 }
  0x17   : > { %p361_p1 = pnand %p360_p0, %p359_p13 }
  0x19   : > { %p362_p2 = pneg %p361_p1 }
  0x1b   : > { %p367_p4 = pnand %p365_p3, %p362_p2 }
  0x1d   : > { %370 = shalt.err (!%p367_p4)
}
  0x1e   : > { %s371_s29 = scalar_lea.vmem %s81_s20, 192  ;;  %p379_p9 = scmp.lt.s32.totalorder %s81_s20, %s81_s20 }
  0x1f   : > { %p372_p7 = scmp.ne.s32.totalorder %s81_s20, %s371_s29  ;;  %p380_p6 = scmp.lt.s32.totalorder %s371_s29, %s371_s29 }
  0x21   : > { %p374_p8 = pnand %p372_p7, %p360_p0  ;;  %p381_p5 = por %p380_p6, %p379_p9 }
  0x23   : > { %p375_p11 = pneg %p374_p8 }
  0x25   : > { %p382_p10 = pnand %p381_p5, %p375_p11 }
  0x27   : > { %385 = shalt.err (!%p382_p10)
}
  0x28   : > { %314 = dma.hbm_to_vmem [thread:$0]  (!%p526_p12), %s607_s0, 192, %s81_s20, [#allocation3]  }
  0x29   : > { %p616_p13 = scmp.ne.s32.totalorder %s614_s18, 0 }
  0x2a   : > { %p617_p1 = scmp.eq.s32.totalorder (!%p616_p13), %s490_s10, 0 }
  0x2b   : > { %93 = sbr.rel (%p616_p13) target bundleno = 82 (0x52), region = 24 }
  0x32   : > { %431 = dma.done.wait (%p617_p1), [#allocation3], 192   ;;  %p618_p0 = pmov %p617_p1 }
  0x33   : > { %s105_s3 = sand.u32 1, %s444_s7   ;;  %v108_v0 = vlaneseq  ;;  %s287_s4 = sshll.u32 %s490_s10, 3  ;;  %v114_v8 = vld [vmem:[#allocation2] ss:$4 sm:$0x7] }
  0x34   : > { %433 = vsyncadd (%p618_p0), [#allocation3], 4294967104  ;;  %s303_s5 = smul.u32 120, %s105_s3  ;;  %v111_v1 = vstv %s287_s4  ;;  %v141_v9 = vld [vmem:[#allocation2 + $0x1] ss:$4 sm:$0x7] }
  0x35   : > { %v109_v2 = vshrl.u32 %v108_v0, 7  ;;  %s304_s11 = smul.u32 384, %s490_s10  ;;  %v163_v14 = vld [vmem:[#allocation2 + $0x2] ss:$4 sm:$0x7]  ;;  %s566_s20 = scalar_lea.sflag [#allocation4], %s105_s3 }
  0x36   : > { %s107_s13 = scalar_lea.vmem [#allocation5], %s303_s5  ;;  %v185_v19 = vld [vmem:[#allocation2 + $0x3] ss:$4 sm:$0x7]  ;;  %p619_p6 = scmp.ne.s32.totalorder %s612_s16, 0 }
  0x37   : > { %v118_v3 = vsub.s32 0, %v109_v2  ;;  %v122_v4 = vsub.s32 1, %v109_v2  ;;  %v126_v5 = vsub.s32 2, %v109_v2  ;;  %v112_v6 = vadd.s32 %v111_v1, %v109_v2  ;;  %s220_s14 = sshll.u32 %s107_s13, 4  ;;  %s560_s19 = scalar_lea.hbm %s608_s1, %s304_s11  ;;  %s562_s14 = int_to_ptr.vmem [resolvable:$true] %s220_s14 }
  0x38   : > { %s386_s21 = scalar_lea.vmem %s562_s14, 1920  ;;  %s455_s22 = smov [#allocation5]  }
  0x39   : > { %v113_v7 = vcvt.s32.f32 %v112_v6  ;;  %v119_v10 = vrot.slane %v114_v8, %v118_v3  ;;  %v123_v11 = vrot.slane %v114_v8, %v122_v4  ;;  %v127_v12 = vrot.slane %v114_v8, %v126_v5  ;;  %p387_p5 = scmp.ne.s32.totalorder %s562_s14, %s386_s21  ;;  %s390_s23 = sshll.u32 %s455_s22, 4  ;;  %s391_s23 = int_to_ptr.vmem [resolvable:$false] %s390_s23 }
  0x3a   : > { %v146_v15 = vrot.slane %v141_v9, %v118_v3  ;;  %v150_v16 = vrot.slane %v141_v9, %v122_v4  ;;  %v154_v17 = vrot.slane %v141_v9, %v126_v5  ;;  %v168_v18 = vrot.slane %v163_v14, %v118_v3  ;;  %s392_s24 = scalar_lea.vmem %s391_s23, 3840  ;;  %p393_p12 = scmp.lt.s32.totalorder %s562_s14, %s391_s23 }
  0x3b   : > { %v134_v13 = vmul.f32 16.0, %v113_v7  ;;  %131 = vst [vmem:[%s107_s13] sm:$0xff] %v119_v10  ;;  %132 = vst [vmem:[%s107_s13 + $0x8] sm:$0xff] %v123_v11  ;;  %v172_v21 = vrot.slane %v163_v14, %v122_v4  ;;  %v176_v22 = vrot.slane %v163_v14, %v126_v5  ;;  %v190_v23 = vrot.slane %v185_v19, %v118_v3  ;;  %p388_p9 = pnand %p387_p5, %p619_p6  ;;  %p394_p2 = scmp.lt.s32.totalorder %s392_s24, %s386_s21 }
  0x3c   : > { %133 = vst [vmem:[%s107_s13 + $0x10] sm:$0xff] %v127_v12  ;;  %291 = vst [vmem:[%s107_s13 + $0x30] sm:$0xff] %v146_v15  ;;  %v194_v24 = vrot.slane %v185_v19, %v122_v4  ;;  %v198_v25 = vrot.slane %v185_v19, %v126_v5 }
  0x3d   : > { %v135_v20 = vadd.f32 8.0, %v134_v13  ;;  %292 = vst [vmem:[%s107_s13 + $0x38] sm:$0xff] %v150_v16  ;;  %293 = vst [vmem:[%s107_s13 + $0x40] sm:$0xff] %v154_v17  ;;  %p389_p10 = pneg %p388_p9  ;;  %p395_p3 = por %p394_p2, %p393_p12 }
  0x3e   : > { %294 = vst [vmem:[%s107_s13 + $0x48] sm:$0xff] %v168_v18  ;;  %295 = vst [vmem:[%s107_s13 + $0x50] sm:$0xff] %v172_v21 }
  0x3f   : > { %288 = vst [vmem:[%s107_s13 + $0x18] sm:$0xff] %v135_v20  ;;  %289 = vst [vmem:[%s107_s13 + $0x20] sm:$0xff] %v135_v20  ;;  %p396_p4 = pnand %p395_p3, %p389_p10 }
  0x40   : > { %290 = vst [vmem:[%s107_s13 + $0x28] sm:$0xff] %v135_v20  ;;  %296 = vst [vmem:[%s107_s13 + $0x58] sm:$0xff] %v176_v22 }
  0x41   : > { %297 = vst [vmem:[%s107_s13 + $0x60] sm:$0xff] %v190_v23  ;;  %298 = vst [vmem:[%s107_s13 + $0x68] sm:$0xff] %v194_v24 }
  0x42   : > { %299 = vst [vmem:[%s107_s13 + $0x70] sm:$0xff] %v198_v25 }
  0x43   : > { %399 = shalt.err (!%p396_p4)
}
  0x44   : > { %s400_s25 = scalar_lea.hbm %s560_s19, 1920  ;;  %s404_s28 = scalar_lea.hbm %s608_s1, 3840 }
  0x45   : > { %p401_p7 = scmp.ne.s32.totalorder %s560_s19, %s400_s25  ;;  %p405_p13 = scmp.lt.u32.totalorder %s560_s19, %s608_s1 }
  0x46   : > { %p406_p1 = scmp.lt.u32.totalorder %s404_s28, %s400_s25  ;;  %p408_p5 = scmp.lt.u32.totalorder %s400_s25, %s560_s19 }
  0x47   : > { %p402_p8 = pnand %p401_p7, %p619_p6 }
  0x48   : > { %p407_p0 = por %p406_p1, %p405_p13 }
  0x49   : > { %p403_p11 = pneg %p402_p8 }
  0x4a   : > { %p409_p9 = por %p408_p5, %p407_p0 }
  0x4c   : > { %p410_p10 = pnand %p409_p9, %p403_p11 }
  0x4e   : > { %413 = shalt.err (!%p410_p10)
}
  0x4f   : > { %s456_s2 = smov 384   ;;  %s457_s3 = smov 768  }
  0x50   : > { %s458_s4 = smov 24  }
  0x51   : > { %309 = dma.vmem_to_hbm [thread:$0]  (%p619_p6), %s562_s14, 1920, %s560_s19, %s566_s20, %s456_s2, %s457_s3, %s458_s4  }
  0x52 PF: > { %p321_p12 = scmp.ge.s32.totalorder %s452_s9, 2  ;;  %s235_s5 = sand.u32 1, %s440_s6  }
  0x53   : > { %p620_p2 = scmp.ne.s32.totalorder %s613_s17, 0  ;;  %s236_s11 = scalar_lea.sflag [#allocation4], %s235_s5 }
  0x55   : > { %p316_p3 = pnand %p321_p12, %p620_p2 }
  0x57   : > { %435 = dma.done.wait (!%p316_p3), %s236_s11, 1920  }
  0x58   : > { %437 = vsyncadd (!%p316_p3), %s236_s11, 4294965376  ;;  %p12_p4 = scmp.ge.s32.totalorder %s494_s12, 4   ;;  %s621_s6 = smov %s444_s7 }
  0x59   : > { %s622_s7 = smov %s448_s8  ;;  %s623_s8 = smov %s505_s15 }
  0x5a   : > { %s624_s9 = smov %s494_s12  ;;  %14 = sbr.rel (!%p12_p4) target bundleno = 4 (0x4), region = 68 }
  0x61   :  { %241 = vsyncpa [#allocation3], 1 }
  0x62   :  { %243 = vsyncpa [#allocation3 + $0x1], 1 }
  0x63   :  { %244 = vsyncpa [#allocation4], 1 }
  0x64   :  { %246 = vsyncpa [#allocation4 + $0x1], 1 }

</bundles_post_ra>
